<compile_context>
chip_gen: v6e
topology: v6e:2x2x1
jax: 0.10.0
libtpu: 0.0.40
codegen_flags: <defaults>
</compile_context>

<pallas_src>
import functools

import jax
import jax.numpy as jnp
from jax import lax
from jax.experimental import pallas as pl
from jax.experimental.pallas import tpu as pltpu

MARGIN = 0.5
EPS = 1e-8  # F.cosine_similarity default eps
TILE = 256  # full MXU tile on v6e/v7x; multiple of 128 so also fine on v5e


def _round_up(x, m):
    return (x + m - 1) // m * m


def _contrastive_cos_kernel(xi_ref, xj_ref, li_ref, lj_ref, out_ref, acc_ref,
                            *, n_valid, margin, need_mask):
    # xi_ref: (TM, D) row-tile of embeddings     (original dtype)
    # xj_ref: (TN, D) col-tile of embeddings     (original dtype)
    # li_ref: (TM, 1) int32 row labels
    # lj_ref: (1, TN) int32 col labels
    # out_ref: (1, 1) f32 in SMEM  — partial loss sum for this row tile
    # acc_ref: (1, 1) f32 in SMEM  — running accumulator over col tiles
    i = pl.program_id(0)
    j = pl.program_id(1)

    @pl.when(j == 0)
    def _init():
        acc_ref[0, 0] = jnp.float32(0.0)

    xi = xi_ref[...].astype(jnp.float32)          # (TM, D)
    xj = xj_ref[...].astype(jnp.float32)          # (TN, D)
    tm = xi.shape[0]
    tn = xj.shape[0]

    # Normalize rows before the matmul: rsqrt(max(||x||^2, eps^2)) matches the
    # per-norm eps clamp of F.cosine_similarity.  EUP rsqrt + N*D multiplies
    # instead of an N x N divide.
    inv_i = lax.rsqrt(jnp.maximum(jnp.sum(xi * xi, axis=-1, keepdims=True),
                                  jnp.float32(EPS * EPS)))
    inv_j = lax.rsqrt(jnp.maximum(jnp.sum(xj * xj, axis=-1, keepdims=True),
                                  jnp.float32(EPS * EPS)))

    # MXU produces cosine similarities directly; contracting both last dims
    # avoids materializing a transpose.
    cos = lax.dot_general(xi * inv_i, xj * inv_j,
                          dimension_numbers=(((1,), (1,)), ((), ())),
                          preferred_element_type=jnp.float32)   # (TM, TN)

    # Pairwise label equality: pure broadcast compare (both orientations were
    # prepared in the wrapper).
    pos = li_ref[...] == lj_ref[...]                            # (TM, TN) bool

    # Fused loss: positive pairs -> 1 - cos, negative pairs -> relu(cos - m).
    loss = jnp.where(pos, 1.0 - cos, jnp.maximum(cos - margin, 0.0))

    if need_mask:  # trace-time flag: only emitted when N was padded
        row_ids = lax.broadcasted_iota(jnp.int32, (tm, tn), 0) + i * tm
        col_ids = lax.broadcasted_iota(jnp.int32, (tm, tn), 1) + j * tn
        valid = (row_ids < n_valid) & (col_ids < n_valid)
        loss = jnp.where(valid, loss, 0.0)

    acc_ref[0, 0] += jnp.sum(loss)

    @pl.when(j == pl.num_programs(1) - 1)
    def _finalize():
        out_ref[0, 0] = acc_ref[0, 0]


def contrastive_loss_cos(embeddings, labels, margin=MARGIN):
    """embeddings: (N, D) float; labels: (N,) int (or list). Scalar f32 loss."""
    embeddings = jnp.asarray(embeddings)
    labels = jnp.asarray(labels, dtype=jnp.int32)
    n, d = embeddings.shape

    # Tile selection: full-MXU 256x256 tiles for large N, otherwise a single
    # tile padded to a sublane multiple (8).
    if n <= TILE:
        n_pad = _round_up(n, 8)
        tm = tn = n_pad
    else:
        n_pad = _round_up(n, TILE)
        tm = tn = TILE
    gi, gj = n_pad // tm, n_pad // tn
    need_mask = n_pad != n

    emb = embeddings
    lab = labels
    if need_mask:
        emb = jnp.pad(emb, ((0, n_pad - n), (0, 0)))
        lab = jnp.pad(lab, (0, n_pad - n))
    lab_row = lab.reshape(n_pad, 1)   # (N, 1)
    lab_col = lab.reshape(1, n_pad)   # (1, N)

    kernel = functools.partial(
        _contrastive_cos_kernel,
        n_valid=n, margin=float(margin), need_mask=need_mask)

    partials = pl.pallas_call(
        kernel,
        out_shape=jax.ShapeDtypeStruct((gi, 1), jnp.float32),
        grid_spec=pltpu.PrefetchScalarGridSpec(
            num_scalar_prefetch=0,
            grid=(gi, gj),   # reduction axis (j) innermost
            in_specs=[
                pl.BlockSpec((tm, d), lambda i, j: (i, 0)),   # row embeddings
                pl.BlockSpec((tn, d), lambda i, j: (j, 0)),   # col embeddings
                pl.BlockSpec((tm, 1), lambda i, j: (i, 0)),   # row labels
                pl.BlockSpec((1, tn), lambda i, j: (0, j)),   # col labels
            ],
            out_specs=pl.BlockSpec((1, 1), lambda i, j: (i, 0),
                                   memory_space=pltpu.MemorySpace.SMEM),
            scratch_shapes=[pltpu.SMEM((1, 1), jnp.float32)],
        ),
        compiler_params=pltpu.CompilerParams(
            # Row-tile axis is independent (per-row-tile partial outputs +
            # per-core scratch) -> "parallel" shards it across v7x's 2 TCs;
            # the column axis is a reduction -> "arbitrary".
            dimension_semantics=("parallel", "arbitrary")),
    )(emb, emb, lab_row, lab_col)

    return jnp.sum(partials) / jnp.float32(n)


def _reference_loss(embeddings, labels, margin=MARGIN):
    # Pure-JAX reference mirroring the PyTorch forward.
    x = embeddings.astype(jnp.float32)
    norms = jnp.maximum(jnp.linalg.norm(x, axis=-1, keepdims=True), EPS)
    cos = (x @ x.T) / (norms * norms.T)
    pos = (labels[:, None] == labels[None, :]).astype(jnp.float32)
    neg = 1.0 - pos
    loss = jnp.sum((1.0 - cos) * pos) + jnp.sum(jnp.maximum(cos - margin, 0.0) * neg)
    return loss / x.shape[0]


if __name__ == "__main__":
    key = jax.random.PRNGKey(0)
    k_emb, k_lab = jax.random.split(key)

    N, D = 8, 32  # batch of 8 embeddings, hidden size 32
    embeddings = jax.random.normal(k_emb, (N, D), dtype=jnp.float32)
    labels = jax.random.randint(k_lab, (N,), 0, 3, dtype=jnp.int32)

    loss = contrastive_loss_cos(embeddings, labels)
    jax.block_until_ready(loss)

    ref = _reference_loss(embeddings, labels)
    assert jnp.allclose(loss, ref, rtol=1e-5, atol=1e-5), (loss, ref)

    print("KERNEL_OK")
</pallas_src>

<mosaic_0001>
module attributes {stable_mosaic.version = 11 : i64} {
  func.func @_contrastive_cos_kernel(%arg0: i32, %arg1: i32, %arg2: memref<8x32xf32, #tpu.memory_space<vmem>>, %arg3: memref<8x32xf32, #tpu.memory_space<vmem>>, %arg4: memref<8x1xi32, #tpu.memory_space<vmem>>, %arg5: memref<1x8xi32, #tpu.memory_space<vmem>>, %arg6: memref<1x1xf32, #tpu.memory_space<smem>>, %arg7: memref<1x1xf32, #tpu.memory_space<smem>>) attributes {dimension_semantics = [#tpu.dimension_semantics<parallel>, #tpu.dimension_semantics<arbitrary>], iteration_bounds = array<i64: 1, 1>, scalar_prefetch = 0 : i64, scratch_operands = 1 : i64, tpu.core_type = #tpu.core_type<tc>, window_params = [{transform_indices = @transform_0, window_bounds = array<i64: 8, 32>}, {transform_indices = @transform_1, window_bounds = array<i64: 8, 32>}, {transform_indices = @transform_2, window_bounds = array<i64: 8, 1>}, {transform_indices = @transform_3, window_bounds = array<i64: 1, 8>}, {transform_indices = @transform_4, window_bounds = array<i64: 1, 1>}]} {
    %c0_i32 = arith.constant 0 : i32
    %0 = arith.cmpi eq, %arg1, %c0_i32 : i32
    %1 = arith.extui %0 : i1 to i32
    %c0_i32_0 = arith.constant 0 : i32
    %2 = arith.cmpi ne, %1, %c0_i32_0 : i32
    scf.if %2 {
      %cst_22 = arith.constant 0.000000e+00 : f32
      %c0_23 = arith.constant 0 : index
      %c0_24 = arith.constant 0 : index
      %44 = memref.load %arg7[%c0_23, %c0_24] : memref<1x1xf32, #tpu.memory_space<smem>>
      memref.store %cst_22, %arg7[%c0_23, %c0_24] : memref<1x1xf32, #tpu.memory_space<smem>>
    } else {
    }
    %c0 = arith.constant 0 : index
    %c0_1 = arith.constant 0 : index
    %3 = vector.load %arg2[%c0, %c0_1] : memref<8x32xf32, #tpu.memory_space<vmem>>, vector<8x32xf32>
    %c0_2 = arith.constant 0 : index
    %c0_3 = arith.constant 0 : index
    %4 = vector.load %arg3[%c0_2, %c0_3] : memref<8x32xf32, #tpu.memory_space<vmem>>, vector<8x32xf32>
    %5 = arith.mulf %3, %3 : vector<8x32xf32>
    %cst = arith.constant dense<0.000000e+00> : vector<8xf32>
    %6 = vector.multi_reduction <add>, %5, %cst [1] : vector<8x32xf32> to vector<8xf32>
    %7 = vector.shape_cast %6 : vector<8xf32> to vector<8x1xf32>
    %cst_4 = arith.constant 1.000000e-16 : f32
    %8 = vector.broadcast %cst_4 : f32 to vector<8x1xf32>
    %9 = arith.maximumf %7, %8 : vector<8x1xf32>
    %10 = math.rsqrt %9 : vector<8x1xf32>
    %11 = arith.mulf %4, %4 : vector<8x32xf32>
    %cst_5 = arith.constant dense<0.000000e+00> : vector<8xf32>
    %12 = vector.multi_reduction <add>, %11, %cst_5 [1] : vector<8x32xf32> to vector<8xf32>
    %13 = vector.shape_cast %12 : vector<8xf32> to vector<8x1xf32>
    %cst_6 = arith.constant 1.000000e-16 : f32
    %14 = vector.broadcast %cst_6 : f32 to vector<8x1xf32>
    %15 = arith.maximumf %13, %14 : vector<8x1xf32>
    %16 = math.rsqrt %15 : vector<8x1xf32>
    %17 = vector.broadcast %10 : vector<8x1xf32> to vector<8x32xf32>
    %18 = arith.mulf %3, %17 : vector<8x32xf32>
    %19 = vector.broadcast %16 : vector<8x1xf32> to vector<8x32xf32>
    %20 = arith.mulf %4, %19 : vector<8x32xf32>
    %cst_7 = arith.constant dense<0.000000e+00> : vector<8x8xf32>
    %21 = tpu.matmul %18, %20, %cst_7 {dimension_numbers = #tpu.dot_dimension_numbers<[1], [1], [0], [0], [0, 0, 1, 0], [], []>} : vector<8x32xf32>, vector<8x32xf32>, vector<8x8xf32> -> vector<8x8xf32>
    %c0_8 = arith.constant 0 : index
    %c0_9 = arith.constant 0 : index
    %22 = vector.load %arg4[%c0_8, %c0_9] : memref<8x1xi32, #tpu.memory_space<vmem>>, vector<8x1xi32>
    %c0_10 = arith.constant 0 : index
    %c0_11 = arith.constant 0 : index
    %23 = vector.load %arg5[%c0_10, %c0_11] : memref<1x8xi32, #tpu.memory_space<vmem>>, vector<1x8xi32>
    %24 = vector.broadcast %22 : vector<8x1xi32> to vector<8x8xi32>
    %25 = vector.broadcast %23 : vector<1x8xi32> to vector<8x8xi32>
    %26 = arith.cmpi eq, %24, %25 : vector<8x8xi32>
    %cst_12 = arith.constant 1.000000e+00 : f32
    %27 = vector.broadcast %cst_12 : f32 to vector<8x8xf32>
    %28 = arith.subf %27, %21 : vector<8x8xf32>
    %cst_13 = arith.constant 5.000000e-01 : f32
    %29 = vector.broadcast %cst_13 : f32 to vector<8x8xf32>
    %30 = arith.subf %21, %29 : vector<8x8xf32>
    %cst_14 = arith.constant 0.000000e+00 : f32
    %31 = vector.broadcast %cst_14 : f32 to vector<8x8xf32>
    %32 = arith.maximumf %30, %31 : vector<8x8xf32>
    %33 = arith.select %26, %28, %32 : vector<8x8xi1>, vector<8x8xf32>
    %c0_15 = arith.constant 0 : index
    %c0_16 = arith.constant 0 : index
    %34 = memref.load %arg7[%c0_15, %c0_16] : memref<1x1xf32, #tpu.memory_space<smem>>
    %35 = vector.shape_cast %33 : vector<8x8xf32> to vector<1x8x8xf32>
    %cst_17 = arith.constant dense<0.000000e+00> : vector<1xf32>
    %36 = vector.multi_reduction <add>, %35, %cst_17 [1, 2] : vector<1x8x8xf32> to vector<1xf32>
    %37 = vector.shape_cast %36 : vector<1xf32> to vector<1x1x1xf32>
    %38 = vector.extract %37[0, 0, 0] : f32 from vector<1x1x1xf32>
    %39 = arith.addf %34, %38 : f32
    %c0_18 = arith.constant 0 : index
    %c0_19 = arith.constant 0 : index
    %40 = memref.load %arg7[%c0_18, %c0_19] : memref<1x1xf32, #tpu.memory_space<smem>>
    memref.store %39, %arg7[%c0_18, %c0_19] : memref<1x1xf32, #tpu.memory_space<smem>>
    %c0_i32_20 = arith.constant 0 : i32
    %41 = arith.cmpi eq, %arg1, %c0_i32_20 : i32
    %42 = arith.extui %41 : i1 to i32
    %c0_i32_21 = arith.constant 0 : i32
    %43 = arith.cmpi ne, %42, %c0_i32_21 : i32
    scf.if %43 {
      %c0_22 = arith.constant 0 : index
      %c0_23 = arith.constant 0 : index
      %44 = memref.load %arg7[%c0_22, %c0_23] : memref<1x1xf32, #tpu.memory_space<smem>>
      %c0_24 = arith.constant 0 : index
      %c0_25 = arith.constant 0 : index
      %45 = memref.load %arg6[%c0_24, %c0_25] : memref<1x1xf32, #tpu.memory_space<smem>>
      memref.store %44, %arg6[%c0_24, %c0_25] : memref<1x1xf32, #tpu.memory_space<smem>>
    } else {
    }
    return
  }
  func.func @transform_0(%arg0: i32, %arg1: i32) -> (i32, i32) {
    %c0_i32 = arith.constant 0 : i32
    %c0_i32_0 = arith.constant 0 : i32
    return %arg0, %c0_i32 : i32, i32
  }
  func.func @transform_1(%arg0: i32, %arg1: i32) -> (i32, i32) {
    %c0_i32 = arith.constant 0 : i32
    %c0_i32_0 = arith.constant 0 : i32
    return %arg1, %c0_i32 : i32, i32
  }
  func.func @transform_2(%arg0: i32, %arg1: i32) -> (i32, i32) {
    %c0_i32 = arith.constant 0 : i32
    %c0_i32_0 = arith.constant 0 : i32
    return %arg0, %c0_i32 : i32, i32
  }
  func.func @transform_3(%arg0: i32, %arg1: i32) -> (i32, i32) {
    %c0_i32 = arith.constant 0 : i32
    %c0_i32_0 = arith.constant 0 : i32
    return %c0_i32, %arg1 : i32, i32
  }
  func.func @transform_4(%arg0: i32, %arg1: i32) -> (i32, i32) {
    %c0_i32 = arith.constant 0 : i32
    %c0_i32_0 = arith.constant 0 : i32
    return %arg0, %c0_i32 : i32, i32
  }
}

</mosaic_0001>

<bundles_post_ra>
// kernel: tpu_custom_call.1
= control target key start
LH: loop header
LB: loop body
LE: loop exit
PB: predicated region body
PF: predicated region fallthrough
CT: control target
= control target key end

     0   :  { %9 = vsyncpa [#allocation4], 0  ;;  %s283_s0 = inlined_call_operand.vmem [shape: f32[8,32], index: 0, kind: input, shape index: {}]   ;;  %s284_s1 = inlined_call_operand.hbm [shape: f32[8,32], index: 1, kind: input, shape index: {}]   ;;  %s285_s2 = inlined_call_operand.vmem [shape: s32[8,1], index: 2, kind: input, shape index: {}]   ;;  %s286_s3 = inlined_call_operand.vmem [shape: s32[1,8], index: 3, kind: input, shape index: {}]   ;;  %s287_s4 = inlined_call_operand.hbm [shape: f32[1,1], index: 4, kind: output, shape index: {}]  }
   0x1   :  { %10 = vsyncpa [#allocation5], 0  ;;  %s234_s15 = smov [#allocation3]  }
   0x2   :  { %s19_s16 = sshll.u32 %s234_s15, 4  ;;  %s20_s16 = int_to_ptr.vmem [resolvable:$true] %s19_s16 }
   0x3   :  { %s210_s17 = scalar_lea.vmem %s20_s16, 128  ;;  %p215_p1 = scmp.lt.s32.totalorder %s20_s16, %s20_s16 }
   0x4   :  { %p211_p0 = scmp.ne.s32.totalorder %s20_s16, %s210_s17  ;;  %p216_p2 = scmp.lt.s32.totalorder %s210_s17, %s210_s17 }
   0x6   :  { %p217_p3 = por %p216_p2, %p215_p1 }
   0x8   :  { %p218_p4 = pnand %p217_p3, %p211_p0 }
   0xa   :  { %221 = shalt.err (!%p218_p4)
}
   0xb   :  { %22 = dma.hbm_to_vmem [thread:$0]  %s284_s1, 128, %s20_s16, [#allocation4]  }
   0xc   :  { %230 = dma.done.wait [#allocation4], 128  }
   0xd   :  { %231 = vsyncadd [#allocation4], 4294967168  ;;  %v37_v0 = vld [vmem:[#allocation3] sm:$0xff]  ;;  %vm39_vm0 = vcmask 261120   ;;  %v235_v6 = vmov 0.0   ;;  %vm236_vm1 = vmmov 0  }
   0xe   :  { %v36_v1 = vld [vmem:[%s283_s0] sm:$0xff]  ;;  %v45_v2 = vmul.f32 %v37_v0, %v37_v0  ;;  %184 = vmatprep.subr.mxu0 %v235_v6  ;;  %186 = vmatprep.mubr.msk.f32.mxu0 %vm236_vm1, %v235_v6  ;;  %v237_v8 = vmov 0   ;;  %vm144_vm3 = vcmask 64512   ;;  %s238_s23 = smov [#allocation6]  }
   0xf   :  { %v38_v3 = vmul.f32 %v36_v1, %v36_v1  ;;  %v129_v7 = vld [vmem:[%s285_s2] sm:$0xff]  ;;  %196 = vset.pattern.permute.xlu1 %v237_v8  ;;  %197 = vset.pattern.permute.xlu0 %v237_v8 }
  0x10   :  { %v46_v4 = vsel %vm39_vm0, %v45_v2, 0.0  ;;  %132 = vperm.xlu1 %196, %v129_v7   ;;  %v180_v17 = vld [vmem:[%s286_s3] ss:$0 sm:$0xff] }
  0x11   :  { %47 = vadd.xlane.f32.xlu0 %v46_v4  ;;  %v40_v5 = vsel %vm39_vm0, %v38_v3, 0.0 }
  0x15   :  { %41 = vadd.xlane.f32.xlu0 %v40_v5 }
  0x8b   :  { %v133_v18 = vpop.permute.xlu1 %132 }
  0x8c   :  { %vm138_vm2 = vcmp.eq.s32.totalorder %v133_v18, %v180_v17 }
  0x9a   :  { %v48_v9 = vpop.xlane.xlu0 %47 }
  0x9b   :  { %v49_v10 = vmax.f32 %v48_v9, 1e-16 }
  0x9d   :  { %198 = vrsqrt.f32 %v49_v10 }
  0x9e   :  { %v42_v11 = vpop.xlane.xlu0 %41 }
  0x9f   :  { %v43_v12 = vmax.f32 %v42_v11, 1e-16 }
  0xa1   :  { %200 = vrsqrt.f32 %v43_v12 }
  0xaa   :  { %v199_v13 = vpop.eup %198 }
  0xab   :  { %v52_v14 = vmul.f32 %v199_v13, %v37_v0 }
  0xad   :  { %185 = vmatpush3.xpose.msk.msra.mxu0 %vm39_vm0, %v52_v14 }
  0xae   :  { %v201_v15 = vpop.eup %200 }
  0xaf   :  { %v51_v16 = vmul.f32 %v201_v15, %v36_v1 }
  0xb1   :  { %187 = vmatmul.mubr.msk.f32.vlgmr.msra.gmra.mxu0 %vm39_vm0, %v51_v16 }
 0x171   :  { %v125_v19 = vpop.f32.mrf.mxu0 }
 0x172   :  { %v181_v20 = vadd.f32 -0.5, %v125_v19  ;;  %v139_v22 = vsub.f32 1.0, %v125_v19 }
 0x173   :  { %v188_v21 = vpop.f32.mrf.mxu0 }
 0x174   :  { %v141_v23 = vmax.f32 %v181_v20, 0.0 }
 0x176   :  { %v142_v24 = vsel %vm138_vm2, %v139_v22, %v141_v23 }
 0x177   :  { %v145_v25 = vsel %vm144_vm3, %v142_v24, 0.0 }
 0x178   :  { %146 = vadd.xlane.f32.xlu1 %v145_v25 }
 0x201   :  { %v147_v26 = vpop.xlane.xlu1 %146 }
 0x202   :  { %v148_v27 = vrot.slane %v147_v26, 4 }
 0x204   :  { %v149_v28 = vadd.f32 %v148_v27, %v147_v26 }
 0x206   :  { %v150_v29 = vrot.slane %v149_v28, 2 }
 0x208   :  { %v151_v30 = vadd.f32 %v150_v29, %v149_v28 }
 0x20a   :  { %v152_v31 = vrot.slane %v151_v30, 1 }
 0x20c   :  { %v153_v32 = vadd.f32 %v152_v31, %v151_v30 }
 0x20e   :  { %189 = vpush %v153_v32 }
 0x23f   :  { %s190_s3 = spop %189 }
 0x240   :  { %163 = sst [smem:[#allocation6]] %s190_s3 }
 0x241   :  { %171 = dma.smem_to_hbm %s238_s23, 16, %s287_s4, [#allocation5]  }
 0x242   :  { %232 = dma.done.wait [#allocation5], 16  }
 0x243   :  { %233 = vsyncadd [#allocation5], 4294967280 }
 0x244   :  { %175 = sfence }
 0x245   :  { %176 = vsyncpa [#allocation4], 1 }
 0x246   :  { %177 = vsyncpa [#allocation5], 1 }

</bundles_post_ra>
